<compile_context>
chip_gen: v5e
topology: v5e:2x2
jax: 0.10.0
libtpu: 0.0.40
codegen_flags: <defaults>
</compile_context>

<pallas_src>
import math
from functools import partial

import jax
import jax.numpy as jnp
from jax import lax
from jax.experimental import pallas as pl
from jax.experimental.pallas import tpu as pltpu


# --------------------------- Kernel 1: QKV projection ------------------------

def _qkv_proj_kernel(x_ref, wqkv_ref, bqkv_ref, q_ref, k_ref, v_ref, *,
                     head_dim, group_heads):
    """Grid = (B, head-group, seq-tile); seq-tile is innermost so this group's
    weight block stays VMEM-resident across the whole sequence.

    x_ref    : (1, TS, E)        bf16 activations (pre-cast in wrapper)
    wqkv_ref : (1, E, 3*G*D)     [Q_g0..Q_gG-1 | K... | V...] columns, bf16;
                                 Q columns pre-scaled by softmax_scale
    bqkv_ref : (1, 1, 3*G*D)     f32 bias (Q part pre-scaled)
    q/k/v_ref: (1, G, TS, D)     per-head outputs in (B, H, S, D) layout, bf16
    """
    D, G = head_dim, group_heads
    x = x_ref[0]                                     # (TS, E) bf16
    w = wqkv_ref[0]                                  # (E, 3*G*D) bf16
    # One MXU pass per (group, seq-tile) with f32 accumulation + f32 bias add.
    qkv = jnp.dot(x, w, preferred_element_type=jnp.float32) + bqkv_ref[0]
    # TODO(synk): for D < 128 these per-head slices/stores are not lane-aligned
    # (masked partial vst); a fused (B,H,S,3D) qkv output would avoid that.
    for g in range(G):                               # static unroll
        q_ref[0, g] = qkv[:, g * D:(g + 1) * D].astype(q_ref.dtype)
        k_ref[0, g] = qkv[:, (G + g) * D:(G + g + 1) * D].astype(k_ref.dtype)
        v_ref[0, g] = qkv[:, (2 * G + g) * D:(2 * G + g + 1) * D].astype(v_ref.dtype)


# ---------------- Kernel 2: flash attention + fused output projection --------

def _flash_attn_outproj_kernel(q_ref, k_ref, v_ref, wout_ref, bout_ref, out_ref,
                               m_sc, l_sc, acc_sc, *, head_dim, group_heads):
    """Grid = (B, q-tile, head-group, kv-tile); head-group and kv-tile are
    reduction axes accumulating into the resident f32 output block.

    q_ref    : (1, G, TQ, D) bf16 (already scaled by softmax_scale via Wq fold)
    k/v_ref  : (1, G, TK, D) bf16
    wout_ref : (1, G*D, E)   bf16   bout_ref : (1, E) f32
    out_ref  : (1, TQ, E)    f32 output-projection accumulator (bias-initialized)
    scratch  : m/l (G, TQ, 1) f32, acc (TQ, G*D) f32
    """
    D, G = head_dim, group_heads
    hg = pl.program_id(2)
    kt = pl.program_id(3)
    n_hg = pl.num_programs(2)
    n_kt = pl.num_programs(3)
    TQ = out_ref.shape[1]
    E = out_ref.shape[2]
    del n_hg  # bias folded into init -> no finalize pass needed

    @pl.when((hg == 0) & (kt == 0))
    def _init_out():
        # Bias folded into the initial value of the resident output block.
        out_ref[0] = jnp.broadcast_to(bout_ref[...], (TQ, E))

    @pl.when(kt == 0)
    def _init_softmax():
        m_sc[...] = jnp.full_like(m_sc, -jnp.inf)
        l_sc[...] = jnp.zeros_like(l_sc)
        acc_sc[...] = jnp.zeros_like(acc_sc)

    # Online (streaming) softmax per head of the group; f32 elementwise math.
    for g in range(G):                               # static unroll
        q = q_ref[0, g]                              # (TQ, D) bf16
        k = k_ref[0, g]                              # (TK, D) bf16
        v = v_ref[0, g]                              # (TK, D) bf16
        # scores = (scaled q) @ k^T without materializing a transpose.
        s = lax.dot_general(q, k, (((1,), (1,)), ((), ())),
                            preferred_element_type=jnp.float32)   # (TQ, TK) f32
        m_prev = m_sc[g]
        m_new = jnp.maximum(m_prev, jnp.max(s, axis=-1, keepdims=True))
        alpha = jnp.exp(m_prev - m_new)
        p = jnp.exp(s - m_new)
        l_sc[g] = alpha * l_sc[g] + jnp.sum(p, axis=-1, keepdims=True)
        pv = jnp.dot(p.astype(jnp.bfloat16), v, preferred_element_type=jnp.float32)
        lo, hi = g * D, (g + 1) * D
        acc_sc[:, lo:hi] = alpha * acc_sc[:, lo:hi] + pv
        m_sc[g] = m_new

    # Group epilogue: normalize each head's lane-slice, then fold the whole
    # group's context into the output projection with one K = G*D MXU matmul
    # (context never round-trips to HBM).
    @pl.when(kt == n_kt - 1)
    def _group_epilogue():
        for g in range(G):
            inv_l = pl.reciprocal(l_sc[g], approx=True)     # EUP slot, off VALU
            lo, hi = g * D, (g + 1) * D
            acc_sc[:, lo:hi] = acc_sc[:, lo:hi] * inv_l
        ctx = acc_sc[...].astype(jnp.bfloat16)              # (TQ, G*D)
        out_ref[0] = out_ref[0] + jnp.dot(ctx, wout_ref[0],
                                          preferred_element_type=jnp.float32)


# --------------------------------- wrapper -----------------------------------

def _divisor_tile(s, target):
    """Largest tile <= target that divides s and is a multiple of 8 (else s)."""
    if s <= target:
        return s
    t = (target // 8) * 8
    while t >= 8:
        if s % t == 0:
            return t
        t -= 8
    # TODO(synk): odd sequence lengths fall back to whole-sequence blocks.
    return s


def _largest_divisor_leq(n, cap):
    cap = max(1, min(n, cap))
    for d in range(cap, 0, -1):
        if n % d == 0:
            return d
    return 1


def _vmem_limit_bytes():
    """Generation-aware VMEM budget: ~100 MB on 128 MiB parts (v5e/v6e),
    ~48 MB on 64 MiB parts (v7x); conservative fallback if the query fails."""
    try:
        cap = pltpu.get_tpu_info().vmem_capacity_bytes
    except Exception:
        cap = 64 * 1024 * 1024
    return int(min(100 * 1024 * 1024, max(32 * 1024 * 1024, 0.75 * cap)))


def hamp_attention_forward(x, wqkv, bqkv, wout, bout, *, num_heads):
    """x: (B,S,E); wqkv: (E,3E) pre-transposed; bqkv: (1,3E); wout: (E,E); bout: (1,E)."""
    B, S, E = x.shape
    H = num_heads
    assert E % H == 0
    D = E // H
    scale = 1.0 / math.sqrt(D)

    vmem_limit = _vmem_limit_bytes()

    # K1 head grouping: keep the double-buffered weight block within budget
    # (v7x has only 64 MiB VMEM per TensorCore); for small E the whole Wqkv
    # ends up resident (single group).
    weight_budget = (16 if vmem_limit >= 80 * 1024 * 1024 else 8) * 1024 * 1024
    g1_cap = max(1, weight_budget // (E * 3 * D * 2))
    G1 = _largest_divisor_leq(H, g1_cap)
    n_hg1 = H // G1

    # K2 head grouping: pack heads so the out-projection contraction is ~256
    # wide (full MXU on v6e/v7x) and fewer grid steps per q-tile.
    G2 = _largest_divisor_leq(H, max(1, 256 // D))
    n_hg2 = H // G2

    # ---- one-time host/XLA-side re-layout (layout plumbing, not compute) ----
    # x cast once to bf16 (halves its DMA; removes a per-step in-kernel cast).
    x_bf = x.astype(jnp.bfloat16)
    w3 = wqkv.reshape(E, 3, H, D)
    b3 = bqkv.reshape(3, H, D)
    # Fold softmax scale into the Q projection so K2 never multiplies the
    # (TQ, TK) score tile in its innermost kv loop.
    wq = w3[:, 0] * scale
    wk, wv = w3[:, 1], w3[:, 2]
    bq = b3[0] * scale
    bk, bv = b3[1], b3[2]

    def _group_w(w):   # (E, H, D) -> (n_hg1, E, G1*D), consecutive heads/group
        return w.reshape(E, n_hg1, G1 * D).transpose(1, 0, 2)

    def _group_b(b):   # (H, D) -> (n_hg1, 1, G1*D)
        return b.reshape(n_hg1, 1, G1 * D)

    wqkv_h = jnp.concatenate([_group_w(wq), _group_w(wk), _group_w(wv)],
                             axis=-1).astype(jnp.bfloat16)        # (n_hg1,E,3*G1*D)
    bqkv_h = jnp.concatenate([_group_b(bq), _group_b(bk), _group_b(bv)],
                             axis=-1).astype(jnp.float32)         # (n_hg1,1,3*G1*D)
    wout_h = wout.reshape(n_hg2, G2 * D, E).astype(jnp.bfloat16)  # (n_hg2,G2*D,E)
    bout_f = bout.astype(jnp.float32)

    TS = _divisor_tile(S, 256)
    n_st = S // TS
    TK = _divisor_tile(S, 256)
    TQ = _divisor_tile(S, 512)   # larger q-tile -> fewer K/V restream passes
    n_qt = S // TQ
    n_kt = S // TK

    qkv_flops = 2 * B * S * E * 3 * E
    qkv_bytes = (n_hg1 * B * S * E * 2 + E * 3 * E * 2 + 3 * E * 4
                 + 3 * B * S * E * 2)

    q, k, v = pl.pallas_call(
        partial(_qkv_proj_kernel, head_dim=D, group_heads=G1),
        out_shape=(
            jax.ShapeDtypeStruct((B, H, S, D), jnp.bfloat16),
            jax.ShapeDtypeStruct((B, H, S, D), jnp.bfloat16),
            jax.ShapeDtypeStruct((B, H, S, D), jnp.bfloat16),
        ),
        grid_spec=pltpu.PrefetchScalarGridSpec(
            num_scalar_prefetch=0,
            grid=(B, n_hg1, n_st),
            in_specs=[
                pl.BlockSpec((1, TS, E), lambda b, hg, st: (b, st, 0)),
                pl.BlockSpec((1, E, 3 * G1 * D), lambda b, hg, st: (hg, 0, 0)),
                pl.BlockSpec((1, 1, 3 * G1 * D), lambda b, hg, st: (hg, 0, 0)),
            ],
            out_specs=[
                pl.BlockSpec((1, G1, TS, D), lambda b, hg, st: (b, hg, st, 0)),
                pl.BlockSpec((1, G1, TS, D), lambda b, hg, st: (b, hg, st, 0)),
                pl.BlockSpec((1, G1, TS, D), lambda b, hg, st: (b, hg, st, 0)),
            ],
        ),
        compiler_params=pltpu.CompilerParams(
            dimension_semantics=("parallel", "parallel", "parallel"),
            vmem_limit_bytes=vmem_limit,
        ),
        cost_estimate=pl.CostEstimate(flops=qkv_flops, transcendentals=0,
                                      bytes_accessed=qkv_bytes),
    )(x_bf, wqkv_h, bqkv_h)

    attn_flops = 4 * B * H * S * S * D + 2 * B * S * E * E
    attn_trans = B * H * S * S
    attn_bytes = (B * S * E * 2 + n_qt * 2 * B * S * E * 2
                  + B * n_qt * E * E * 2 + B * S * E * 4)

    out_f32 = pl.pallas_call(
        partial(_flash_attn_outproj_kernel, head_dim=D, group_heads=G2),
        out_shape=jax.ShapeDtypeStruct((B, S, E), jnp.float32),
        grid_spec=pltpu.PrefetchScalarGridSpec(
            num_scalar_prefetch=0,
            grid=(B, n_qt, n_hg2, n_kt),
            in_specs=[
                pl.BlockSpec((1, G2, TQ, D), lambda b, qt, hg, kt: (b, hg, qt, 0)),
                pl.BlockSpec((1, G2, TK, D), lambda b, qt, hg, kt: (b, hg, kt, 0)),
                pl.BlockSpec((1, G2, TK, D), lambda b, qt, hg, kt: (b, hg, kt, 0)),
                pl.BlockSpec((1, G2 * D, E), lambda b, qt, hg, kt: (hg, 0, 0)),
                pl.BlockSpec((1, E), lambda b, qt, hg, kt: (0, 0)),
            ],
            out_specs=pl.BlockSpec((1, TQ, E), lambda b, qt, hg, kt: (b, qt, 0)),
            scratch_shapes=[
                pltpu.VMEM((G2, TQ, 1), jnp.float32),   # running max per head
                pltpu.VMEM((G2, TQ, 1), jnp.float32),   # running sum per head
                pltpu.VMEM((TQ, G2 * D), jnp.float32),  # head-group context acc
            ],
        ),
        compiler_params=pltpu.CompilerParams(
            dimension_semantics=("parallel", "parallel", "arbitrary", "arbitrary"),
            vmem_limit_bytes=vmem_limit,
        ),
        cost_estimate=pl.CostEstimate(flops=attn_flops, transcendentals=attn_trans,
                                      bytes_accessed=attn_bytes),
    )(q, k, v, wout_h, bout_f)

    return out_f32.astype(x.dtype)


# ------------------------------ reference & test -----------------------------

def _reference_forward(x, wqkv, bqkv, wout, bout, *, num_heads):
    """Pure-JAX f32 reference mirroring the PyTorch module (single-rank path)."""
    B, S, E = x.shape
    D = E // num_heads
    scale = 1.0 / math.sqrt(D)
    qkv = jnp.einsum("bse,ef->bsf", x, wqkv) + bqkv[0]
    qkv = qkv.reshape(B, S, 3, num_heads, D)
    q, k, v = qkv[:, :, 0], qkv[:, :, 1], qkv[:, :, 2]
    scores = jnp.einsum("bthd,bshd->bhts", q, k) * scale
    attn = jax.nn.softmax(scores, axis=-1)
    ctx = jnp.einsum("bhts,bshd->bthd", attn, v).reshape(B, S, E)
    return jnp.einsum("bse,ef->bsf", ctx, wout) + bout[0]


def _run_case(key, batch, seqlen, embed_dim, num_heads, rel_tol):
    k_x, k_wqkv, k_bqkv, k_wout, k_bout = jax.random.split(key, 5)
    x = jax.random.normal(k_x, (batch, seqlen, embed_dim), dtype=jnp.float32)
    # Shapes from __init__: Wqkv: E -> 3E, out_proj: E -> E (stored pre-transposed).
    wqkv = jax.random.normal(k_wqkv, (embed_dim, 3 * embed_dim), jnp.float32) * 0.05
    bqkv = jax.random.normal(k_bqkv, (1, 3 * embed_dim), jnp.float32) * 0.05
    wout = jax.random.normal(k_wout, (embed_dim, embed_dim), jnp.float32) * 0.05
    bout = jax.random.normal(k_bout, (1, embed_dim), jnp.float32) * 0.05

    out = hamp_attention_forward(x, wqkv, bqkv, wout, bout, num_heads=num_heads)
    out = jax.block_until_ready(out)
    ref = _reference_forward(x, wqkv, bqkv, wout, bout, num_heads=num_heads)
    assert out.shape == (batch, seqlen, embed_dim)
    # bf16 MXU operands + approx reciprocal -> loosened tolerance vs f32 ref.
    err = float(jnp.max(jnp.abs(out - ref)))
    ref_scale = float(jnp.max(jnp.abs(ref)))
    assert err <= rel_tol * max(ref_scale, 1.0), (err, ref_scale)


if __name__ == "__main__":
    # Small shapes consistent with the module's forward signature (B, S, E).
    _run_case(jax.random.PRNGKey(0), batch=2, seqlen=8, embed_dim=32,
              num_heads=4, rel_tol=2e-2)
    # Larger case that exercises the tiled paths: multiple K1 sequence tiles,
    # multiple K2 kv-tiles (online-softmax accumulation) and multiple K2 head
    # groups (output-projection accumulation into the resident block).
    _run_case(jax.random.PRNGKey(0), batch=1, seqlen=512, embed_dim=512,
              num_heads=4, rel_tol=5e-2)

    # TODO(synk): dist.scatter / dist.gather across dp_group, the multi-rank
    # kv-cache decode path (inference_params) and rotary embeddings have no
    # single-device Pallas equivalent here; they are identity / disabled paths
    # for dp_world_size == 1, inference_params is None, rotary_emb_dim == 0.
    print("KERNEL_OK")
</pallas_src>

<mosaic_0001>
module attributes {stable_mosaic.version = 11 : i64} {
  func.func @_qkv_proj_kernel(%arg0: i32, %arg1: i32, %arg2: i32, %arg3: memref<1x8x32xbf16, #tpu.memory_space<vmem>>, %arg4: memref<1x32x96xbf16, #tpu.memory_space<vmem>>, %arg5: memref<1x1x96xf32, #tpu.memory_space<vmem>>, %arg6: memref<1x4x8x8xbf16, #tpu.memory_space<vmem>>, %arg7: memref<1x4x8x8xbf16, #tpu.memory_space<vmem>>, %arg8: memref<1x4x8x8xbf16, #tpu.memory_space<vmem>>) attributes {dimension_semantics = [#tpu.dimension_semantics<parallel>, #tpu.dimension_semantics<parallel>, #tpu.dimension_semantics<parallel>], iteration_bounds = array<i64: 2, 1, 1>, scalar_prefetch = 0 : i64, scratch_operands = 0 : i64, tpu.core_type = #tpu.core_type<tc>, window_params = [{transform_indices = @transform_0, window_bounds = array<i64: 1, 8, 32>}, {transform_indices = @transform_1, window_bounds = array<i64: 1, 32, 96>}, {transform_indices = @transform_2, window_bounds = array<i64: 1, 1, 96>}, {transform_indices = @transform_3, window_bounds = array<i64: 1, 4, 8, 8>}, {transform_indices = @transform_4, window_bounds = array<i64: 1, 4, 8, 8>}, {transform_indices = @transform_5, window_bounds = array<i64: 1, 4, 8, 8>}]} {
    %c0 = arith.constant 0 : index
    %c0_0 = arith.constant 0 : index
    %c0_1 = arith.constant 0 : index
    %0 = vector.load %arg3[%c0, %c0_0, %c0_1] : memref<1x8x32xbf16, #tpu.memory_space<vmem>>, vector<1x8x32xbf16>
    %1 = vector.shape_cast %0 : vector<1x8x32xbf16> to vector<8x32xbf16>
    %c0_2 = arith.constant 0 : index
    %c0_3 = arith.constant 0 : index
    %c0_4 = arith.constant 0 : index
    %2 = vector.load %arg4[%c0_2, %c0_3, %c0_4] : memref<1x32x96xbf16, #tpu.memory_space<vmem>>, vector<1x32x96xbf16>
    %3 = vector.shape_cast %2 : vector<1x32x96xbf16> to vector<32x96xbf16>
    %cst = arith.constant dense<0.000000e+00> : vector<8x96xf32>
    %4 = tpu.matmul %1, %3, %cst {dimension_numbers = #tpu.dot_dimension_numbers<[1], [0], [0], [1], [0, 0, 1, 1], [], []>} : vector<8x32xbf16>, vector<32x96xbf16>, vector<8x96xf32> -> vector<8x96xf32>
    %c0_5 = arith.constant 0 : index
    %c0_6 = arith.constant 0 : index
    %c0_7 = arith.constant 0 : index
    %5 = vector.load %arg5[%c0_5, %c0_6, %c0_7] : memref<1x1x96xf32, #tpu.memory_space<vmem>>, vector<1x1x96xf32>
    %6 = vector.shape_cast %5 : vector<1x1x96xf32> to vector<1x96xf32>
    %7 = vector.broadcast %6 : vector<1x96xf32> to vector<8x96xf32>
    %8 = arith.addf %4, %7 : vector<8x96xf32>
    %9 = vector.extract_strided_slice %8 {offsets = [0, 0], sizes = [8, 8], strides = [1, 1]} : vector<8x96xf32> to vector<8x8xf32>
    %10 = arith.truncf %9 : vector<8x8xf32> to vector<8x8xbf16>
    %c0_8 = arith.constant 0 : index
    %c0_9 = arith.constant 0 : index
    %c0_10 = arith.constant 0 : index
    %c0_11 = arith.constant 0 : index
    %11 = vector.load %arg6[%c0_8, %c0_9, %c0_10, %c0_11] : memref<1x4x8x8xbf16, #tpu.memory_space<vmem>>, vector<1x1x8x8xbf16>
    %12 = vector.shape_cast %11 : vector<1x1x8x8xbf16> to vector<8x8xbf16>
    %13 = vector.shape_cast %10 : vector<8x8xbf16> to vector<1x1x8x8xbf16>
    tpu.vector_store %arg6[%c0_8, %c0_9, %c0_10, %c0_11], %13 {strides = array<i32>} : memref<1x4x8x8xbf16, #tpu.memory_space<vmem>>, vector<1x1x8x8xbf16>,
    %14 = vector.extract_strided_slice %8 {offsets = [0, 32], sizes = [8, 8], strides = [1, 1]} : vector<8x96xf32> to vector<8x8xf32>
    %15 = arith.truncf %14 : vector<8x8xf32> to vector<8x8xbf16>
    %c0_12 = arith.constant 0 : index
    %c0_13 = arith.constant 0 : index
    %c0_14 = arith.constant 0 : index
    %c0_15 = arith.constant 0 : index
    %16 = vector.load %arg7[%c0_12, %c0_13, %c0_14, %c0_15] : memref<1x4x8x8xbf16, #tpu.memory_space<vmem>>, vector<1x1x8x8xbf16>
    %17 = vector.shape_cast %16 : vector<1x1x8x8xbf16> to vector<8x8xbf16>
    %18 = vector.shape_cast %15 : vector<8x8xbf16> to vector<1x1x8x8xbf16>
    tpu.vector_store %arg7[%c0_12, %c0_13, %c0_14, %c0_15], %18 {strides = array<i32>} : memref<1x4x8x8xbf16, #tpu.memory_space<vmem>>, vector<1x1x8x8xbf16>,
    %19 = vector.extract_strided_slice %8 {offsets = [0, 64], sizes = [8, 8], strides = [1, 1]} : vector<8x96xf32> to vector<8x8xf32>
    %20 = arith.truncf %19 : vector<8x8xf32> to vector<8x8xbf16>
    %c0_16 = arith.constant 0 : index
    %c0_17 = arith.constant 0 : index
    %c0_18 = arith.constant 0 : index
    %c0_19 = arith.constant 0 : index
    %21 = vector.load %arg8[%c0_16, %c0_17, %c0_18, %c0_19] : memref<1x4x8x8xbf16, #tpu.memory_space<vmem>>, vector<1x1x8x8xbf16>
    %22 = vector.shape_cast %21 : vector<1x1x8x8xbf16> to vector<8x8xbf16>
    %23 = vector.shape_cast %20 : vector<8x8xbf16> to vector<1x1x8x8xbf16>
    tpu.vector_store %arg8[%c0_16, %c0_17, %c0_18, %c0_19], %23 {strides = array<i32>} : memref<1x4x8x8xbf16, #tpu.memory_space<vmem>>, vector<1x1x8x8xbf16>,
    %24 = vector.extract_strided_slice %8 {offsets = [0, 8], sizes = [8, 8], strides = [1, 1]} : vector<8x96xf32> to vector<8x8xf32>
    %25 = arith.truncf %24 : vector<8x8xf32> to vector<8x8xbf16>
    %c0_20 = arith.constant 0 : index
    %c1 = arith.constant 1 : index
    %c0_21 = arith.constant 0 : index
    %c0_22 = arith.constant 0 : index
    %26 = vector.load %arg6[%c0_20, %c1, %c0_21, %c0_22] : memref<1x4x8x8xbf16, #tpu.memory_space<vmem>>, vector<1x1x8x8xbf16>
    %27 = vector.shape_cast %26 : vector<1x1x8x8xbf16> to vector<8x8xbf16>
    %28 = vector.shape_cast %25 : vector<8x8xbf16> to vector<1x1x8x8xbf16>
    tpu.vector_store %arg6[%c0_20, %c1, %c0_21, %c0_22], %28 {strides = array<i32>} : memref<1x4x8x8xbf16, #tpu.memory_space<vmem>>, vector<1x1x8x8xbf16>,
    %29 = vector.extract_strided_slice %8 {offsets = [0, 40], sizes = [8, 8], strides = [1, 1]} : vector<8x96xf32> to vector<8x8xf32>
    %30 = arith.truncf %29 : vector<8x8xf32> to vector<8x8xbf16>
    %c0_23 = arith.constant 0 : index
    %c1_24 = arith.constant 1 : index
    %c0_25 = arith.constant 0 : index
    %c0_26 = arith.constant 0 : index
    %31 = vector.load %arg7[%c0_23, %c1_24, %c0_25, %c0_26] : memref<1x4x8x8xbf16, #tpu.memory_space<vmem>>, vector<1x1x8x8xbf16>
    %32 = vector.shape_cast %31 : vector<1x1x8x8xbf16> to vector<8x8xbf16>
    %33 = vector.shape_cast %30 : vector<8x8xbf16> to vector<1x1x8x8xbf16>
    tpu.vector_store %arg7[%c0_23, %c1_24, %c0_25, %c0_26], %33 {strides = array<i32>} : memref<1x4x8x8xbf16, #tpu.memory_space<vmem>>, vector<1x1x8x8xbf16>,
    %34 = vector.extract_strided_slice %8 {offsets = [0, 72], sizes = [8, 8], strides = [1, 1]} : vector<8x96xf32> to vector<8x8xf32>
    %35 = arith.truncf %34 : vector<8x8xf32> to vector<8x8xbf16>
    %c0_27 = arith.constant 0 : index
    %c1_28 = arith.constant 1 : index
    %c0_29 = arith.constant 0 : index
    %c0_30 = arith.constant 0 : index
    %36 = vector.load %arg8[%c0_27, %c1_28, %c0_29, %c0_30] : memref<1x4x8x8xbf16, #tpu.memory_space<vmem>>, vector<1x1x8x8xbf16>
    %37 = vector.shape_cast %36 : vector<1x1x8x8xbf16> to vector<8x8xbf16>
    %38 = vector.shape_cast %35 : vector<8x8xbf16> to vector<1x1x8x8xbf16>
    tpu.vector_store %arg8[%c0_27, %c1_28, %c0_29, %c0_30], %38 {strides = array<i32>} : memref<1x4x8x8xbf16, #tpu.memory_space<vmem>>, vector<1x1x8x8xbf16>,
    %39 = vector.extract_strided_slice %8 {offsets = [0, 16], sizes = [8, 8], strides = [1, 1]} : vector<8x96xf32> to vector<8x8xf32>
    %40 = arith.truncf %39 : vector<8x8xf32> to vector<8x8xbf16>
    %c0_31 = arith.constant 0 : index
    %c2 = arith.constant 2 : index
    %c0_32 = arith.constant 0 : index
    %c0_33 = arith.constant 0 : index
    %41 = vector.load %arg6[%c0_31, %c2, %c0_32, %c0_33] : memref<1x4x8x8xbf16, #tpu.memory_space<vmem>>, vector<1x1x8x8xbf16>
    %42 = vector.shape_cast %41 : vector<1x1x8x8xbf16> to vector<8x8xbf16>
    %43 = vector.shape_cast %40 : vector<8x8xbf16> to vector<1x1x8x8xbf16>
    tpu.vector_store %arg6[%c0_31, %c2, %c0_32, %c0_33], %43 {strides = array<i32>} : memref<1x4x8x8xbf16, #tpu.memory_space<vmem>>, vector<1x1x8x8xbf16>,
    %44 = vector.extract_strided_slice %8 {offsets = [0, 48], sizes = [8, 8], strides = [1, 1]} : vector<8x96xf32> to vector<8x8xf32>
    %45 = arith.truncf %44 : vector<8x8xf32> to vector<8x8xbf16>
    %c0_34 = arith.constant 0 : index
    %c2_35 = arith.constant 2 : index
    %c0_36 = arith.constant 0 : index
    %c0_37 = arith.constant 0 : index
    %46 = vector.load %arg7[%c0_34, %c2_35, %c0_36, %c0_37] : memref<1x4x8x8xbf16, #tpu.memory_space<vmem>>, vector<1x1x8x8xbf16>
    %47 = vector.shape_cast %46 : vector<1x1x8x8xbf16> to vector<8x8xbf16>
    %48 = vector.shape_cast %45 : vector<8x8xbf16> to vector<1x1x8x8xbf16>
    tpu.vector_store %arg7[%c0_34, %c2_35, %c0_36, %c0_37], %48 {strides = array<i32>} : memref<1x4x8x8xbf16, #tpu.memory_space<vmem>>, vector<1x1x8x8xbf16>,
    %49 = vector.extract_strided_slice %8 {offsets = [0, 80], sizes = [8, 8], strides = [1, 1]} : vector<8x96xf32> to vector<8x8xf32>
    %50 = arith.truncf %49 : vector<8x8xf32> to vector<8x8xbf16>
    %c0_38 = arith.constant 0 : index
    %c2_39 = arith.constant 2 : index
    %c0_40 = arith.constant 0 : index
    %c0_41 = arith.constant 0 : index
    %51 = vector.load %arg8[%c0_38, %c2_39, %c0_40, %c0_41] : memref<1x4x8x8xbf16, #tpu.memory_space<vmem>>, vector<1x1x8x8xbf16>
    %52 = vector.shape_cast %51 : vector<1x1x8x8xbf16> to vector<8x8xbf16>
    %53 = vector.shape_cast %50 : vector<8x8xbf16> to vector<1x1x8x8xbf16>
    tpu.vector_store %arg8[%c0_38, %c2_39, %c0_40, %c0_41], %53 {strides = array<i32>} : memref<1x4x8x8xbf16, #tpu.memory_space<vmem>>, vector<1x1x8x8xbf16>,
    %54 = vector.extract_strided_slice %8 {offsets = [0, 24], sizes = [8, 8], strides = [1, 1]} : vector<8x96xf32> to vector<8x8xf32>
    %55 = arith.truncf %54 : vector<8x8xf32> to vector<8x8xbf16>
    %c0_42 = arith.constant 0 : index
    %c3 = arith.constant 3 : index
    %c0_43 = arith.constant 0 : index
    %c0_44 = arith.constant 0 : index
    %56 = vector.load %arg6[%c0_42, %c3, %c0_43, %c0_44] : memref<1x4x8x8xbf16, #tpu.memory_space<vmem>>, vector<1x1x8x8xbf16>
    %57 = vector.shape_cast %56 : vector<1x1x8x8xbf16> to vector<8x8xbf16>
    %58 = vector.shape_cast %55 : vector<8x8xbf16> to vector<1x1x8x8xbf16>
    tpu.vector_store %arg6[%c0_42, %c3, %c0_43, %c0_44], %58 {strides = array<i32>} : memref<1x4x8x8xbf16, #tpu.memory_space<vmem>>, vector<1x1x8x8xbf16>,
    %59 = vector.extract_strided_slice %8 {offsets = [0, 56], sizes = [8, 8], strides = [1, 1]} : vector<8x96xf32> to vector<8x8xf32>
    %60 = arith.truncf %59 : vector<8x8xf32> to vector<8x8xbf16>
    %c0_45 = arith.constant 0 : index
    %c3_46 = arith.constant 3 : index
    %c0_47 = arith.constant 0 : index
    %c0_48 = arith.constant 0 : index
    %61 = vector.load %arg7[%c0_45, %c3_46, %c0_47, %c0_48] : memref<1x4x8x8xbf16, #tpu.memory_space<vmem>>, vector<1x1x8x8xbf16>
    %62 = vector.shape_cast %61 : vector<1x1x8x8xbf16> to vector<8x8xbf16>
    %63 = vector.shape_cast %60 : vector<8x8xbf16> to vector<1x1x8x8xbf16>
    tpu.vector_store %arg7[%c0_45, %c3_46, %c0_47, %c0_48], %63 {strides = array<i32>} : memref<1x4x8x8xbf16, #tpu.memory_space<vmem>>, vector<1x1x8x8xbf16>,
    %64 = vector.extract_strided_slice %8 {offsets = [0, 88], sizes = [8, 8], strides = [1, 1]} : vector<8x96xf32> to vector<8x8xf32>
    %65 = arith.truncf %64 : vector<8x8xf32> to vector<8x8xbf16>
    %c0_49 = arith.constant 0 : index
    %c3_50 = arith.constant 3 : index
    %c0_51 = arith.constant 0 : index
    %c0_52 = arith.constant 0 : index
    %66 = vector.load %arg8[%c0_49, %c3_50, %c0_51, %c0_52] : memref<1x4x8x8xbf16, #tpu.memory_space<vmem>>, vector<1x1x8x8xbf16>
    %67 = vector.shape_cast %66 : vector<1x1x8x8xbf16> to vector<8x8xbf16>
    %68 = vector.shape_cast %65 : vector<8x8xbf16> to vector<1x1x8x8xbf16>
    tpu.vector_store %arg8[%c0_49, %c3_50, %c0_51, %c0_52], %68 {strides = array<i32>} : memref<1x4x8x8xbf16, #tpu.memory_space<vmem>>, vector<1x1x8x8xbf16>,
    return
  }
  func.func @transform_0(%arg0: i32, %arg1: i32, %arg2: i32) -> (i32, i32, i32) {
    %c0_i32 = arith.constant 0 : i32
    %c0_i32_0 = arith.constant 0 : i32
    return %arg0, %arg2, %c0_i32 : i32, i32, i32
  }
  func.func @transform_1(%arg0: i32, %arg1: i32, %arg2: i32) -> (i32, i32, i32) {
    %c0_i32 = arith.constant 0 : i32
    %c0_i32_0 = arith.constant 0 : i32
    %c0_i32_1 = arith.constant 0 : i32
    return %arg1, %c0_i32, %c0_i32_0 : i32, i32, i32
  }
  func.func @transform_2(%arg0: i32, %arg1: i32, %arg2: i32) -> (i32, i32, i32) {
    %c0_i32 = arith.constant 0 : i32
    %c0_i32_0 = arith.constant 0 : i32
    %c0_i32_1 = arith.constant 0 : i32
    return %arg1, %c0_i32, %c0_i32_0 : i32, i32, i32
  }
  func.func @transform_3(%arg0: i32, %arg1: i32, %arg2: i32) -> (i32, i32, i32, i32) {
    %c0_i32 = arith.constant 0 : i32
    %c0_i32_0 = arith.constant 0 : i32
    return %arg0, %arg1, %arg2, %c0_i32 : i32, i32, i32, i32
  }
  func.func @transform_4(%arg0: i32, %arg1: i32, %arg2: i32) -> (i32, i32, i32, i32) {
    %c0_i32 = arith.constant 0 : i32
    %c0_i32_0 = arith.constant 0 : i32
    return %arg0, %arg1, %arg2, %c0_i32 : i32, i32, i32, i32
  }
  func.func @transform_5(%arg0: i32, %arg1: i32, %arg2: i32) -> (i32, i32, i32, i32) {
    %c0_i32 = arith.constant 0 : i32
    %c0_i32_0 = arith.constant 0 : i32
    return %arg0, %arg1, %arg2, %c0_i32 : i32, i32, i32, i32
  }
}

</mosaic_0001>

<bundles_post_ra>
// kernel: tpu_custom_call.1
= control target key start
LH: loop header
LB: loop body
LE: loop exit
PB: predicated region body
PF: predicated region fallthrough
CT: control target
= control target key end

     0   :  { %s1325_s0 = inlined_call_operand.hbm [shape: bf16[2,8,32], index: 0, kind: input, shape index: {}]   ;;  %s1326_s1 = inlined_call_operand.hbm [shape: bf16[1,32,96], index: 1, kind: input, shape index: {}]   ;;  %s1327_s2 = inlined_call_operand.vmem [shape: f32[1,1,96], index: 2, kind: input, shape index: {}]   ;;  %s1328_s3 = inlined_call_operand.hbm [shape: bf16[2,4,8,8], index: 3, kind: output, shape index: {0}]   ;;  %s1329_s4 = inlined_call_operand.hbm [shape: bf16[2,4,8,8], index: 4, kind: output, shape index: {1}]   ;;  %s1330_s5 = inlined_call_operand.hbm [shape: bf16[2,4,8,8], index: 5, kind: output, shape index: {2}]  }
   0x1   :  { %1336 = sst [smem:[#allocation15_spill]] %s1325_s0 }
   0x2   :  { %11 = vsyncpa [#allocation3], 0 }
   0x3   :  { %13 = vsyncpa [#allocation3 + $0x1], 0 }
   0x4   :  { %14 = vsyncpa [#allocation6], 0 }
   0x5   :  { %15 = vsyncpa [#allocation4], 0 }
   0x6   :  { %17 = vsyncpa [#allocation4 + $0x1], 0 }
   0x7   :  { %18 = vsyncpa [#allocation9], 0 }
   0x8   :  { %20 = vsyncpa [#allocation9 + $0x1], 0  ;;  %s1084_s18 = smov 0   ;;  %s1086_s19 = smov 0  }
   0x9   :  { %s1088_s20 = smov 0   ;;  %s1090_s21 = smov 0  }
   0xa   :  { %s1092_s22 = smov 0   ;;  %s1094_s23 = smov 0  }
   0xb LB: > { %s1115_s24 = sadd.s32 4294967295, %s1037_s23   ;;  %p687_p0 = scmp.ge.s32.totalorder %s1037_s23, 1  ;;  %s1037_s23 = sphi %s1094_s23, %s26_s23   ;;  %s1033_s22 = sphi %s1092_s22, %s1350_s22   ;;  %s1029_s21 = sphi %s1090_s21, %s1349_s21   ;;  %s1025_s20 = sphi %s1088_s20, %s1348_s20   ;;  %s1021_s19 = sphi %s1086_s19, %s1347_s19   ;;  %s1017_s18 = sphi %s1084_s18, %s1346_s18  }
   0xc   : > { %p68_p1 = scmp.eq.s32.totalorder %s1115_s24, 0  ;;  %p220_p2 = scmp.lt.s32.totalorder %s1037_s23, 3 }
   0xd   : > { %s234_s27 = sshll.u32 %s1326_s1, 4  ;;  %s1039_s29 = smov [#allocation5]   ;;  %s235_s27 = int_to_ptr.hbm [resolvable:$true] %s234_s27 }
   0xe   : > { %p1123_p3 = pnand %p687_p0, %p220_p2  ;;  %s236_s30 = sshll.u32 %s1039_s29, 4  ;;  %s237_s30 = int_to_ptr.vmem [resolvable:$true] %s236_s30 }
   0xf   : > { %p690_p6 = scmp.ge.s32.totalorder %s1037_s23, 2  ;;  %s1040_s6 = smov 64  }
  0x10   : > { %p745_p4 = pneg %p1123_p3  ;;  %s1041_s7 = smov 4  }
  0x11   : > { %s1331_s8 = sadd.s32 4294967294, %s1037_s23   ;;  %s45_s9 = sadd.s32 1, %s1033_s22 }
  0x12   : > { %p746_p5 = pnand %p745_p4, %p68_p1  ;;  %s54_s10 = sadd.s32 1, %s1025_s20 }
  0x13   : > { %p47_p7 = scmp.ge.s32.totalorder %s45_s9, 2  ;;  %p61_p8 = scmp.ne.s32.totalorder %s1025_s20, %s1021_s19 }
  0x14   : > { %748 = dma.hbm_to_vmem [thread:$0]  (!%p746_p5), %s235_s27, 256, %s237_s30, [#allocation6], %s1040_s6, %s1040_s6, %s1041_s7  }
  0x15   : > { %p62_p9 = scmp.eq.s32.totalorder %s1037_s23, 0  ;;  %p67_p10 = scmp.ne.s32.totalorder %s1021_s19, %s1017_s18 }
  0x16   : > { %s1352_s9 = smov (%p47_p7, %s45_s9), 0  ;;  %p147_p13 = scmp.eq.s32.totalorder %s1115_s24, 1 }
  0x17   : > { %p1142_p11 = por %p62_p9, %p61_p8  ;;  %p1148_p12 = por %p68_p1, %p67_p10 }
  0x18   : > { %s49_s13 = ssub.s32 %s1033_s22, %s1352_s9  ;;  %p153_p2 = scmp.eq.s32.totalorder %s1331_s8, 1 }
  0x19   : > { %p52_p0 = scmp.eq.s32.totalorder %s49_s13, 0  ;;  %p1157_p4 = por %p147_p13, %p61_p8 }
  0x1a   : > { %p764_p5 = scmp.lt.s32.totalorder %s1037_s23, 2  ;;  %p1165_p7 = por %p153_p2, %p67_p10 }
  0x1b   : > { %s1163_s15 = scalar_select %p52_p0, %s1025_s20, %s54_s10  }
  0x1c   : > { %s256_s17 = sand.u32 1, %s1025_s20   ;;  %s692_s26 = sshll.u32 %s1033_s22, 2 }
  0x1d   : > { %s691_s25 = sshll.u32 %s256_s17, 2  ;;  %s1342_s0 = sld [smem:[#allocation15_spill]] }
  0x1e   : > { %s260_s6 = scalar_lea.vmem [#allocation2], %s691_s25  ;;  %p750_p8 = pnand %p764_p5, %p1142_p11 }
  0x1f   : > { %s269_s7 = sshll.u32 %s260_s6, 4  ;;  %s257_s10 = scalar_lea.sflag [#allocation3], %s256_s17  ;;  %s270_s7 = int_to_ptr.vmem [resolvable:$true] %s269_s7 }
  0x20   : > { %s1179_s8 = sand.u32 (!%p1123_p3), 1, %s1021_s19  }
  0x21   : > { %278 = sbr.rel (%p1123_p3) target bundleno = 334 (0x14e), region = 32  ;;  %s694_s27 = sshll.u32 (!%p1123_p3), %s1179_s8, 2 }
  0x22   : > { %s284_s25 = scalar_lea.vmem (!%p1123_p3), [#allocation2], %s694_s27 }
  0x23   : > { %s265_s30 = scalar_lea.hbm %s1342_s0, %s692_s26  ;;  %s281_s26 = scalar_lea.sflag (!%p1123_p3), [#allocation3], %s1179_s8 }
  0x24   : > { %s267_s13 = sshll.u32 %s265_s30, 4  ;;  %s268_s13 = int_to_ptr.hbm [resolvable:$true] %s267_s13 }
  0x25   : > { %752 = dma.hbm_to_vmem [thread:$0]  (!%p750_p8), %s268_s13, 64, %s270_s7, %s257_s10  }
  0x26   : > { %1000 = dma.done.wait (%p1148_p12), %s281_s26, 64  }
  0x27   : > { %1002 = vsyncadd (%p1148_p12), %s281_s26, 4294967232 }
  0x28   : > { %1004 = dma.done.wait (%p68_p1), [#allocation6], 256  }
  0x29   : > { %1006 = vsyncadd (%p68_p1), [#allocation6], 4294967040  ;;  %v729_v0 = vld [vmem:[#allocation5 + $0x8] sm:$0xff]  ;;  %v728_v1 = vld [vmem:[#allocation5] sm:$0xff]  ;;  %vm358_vm0 = vcmask 261120   ;;  %s1195_s12 = sshll.u32 %s1179_s8, 4 }
  0x2a   : > { %368 = vmatpush.bf16.msra.mxu0 %v729_v0  ;;  %v337_v2 = vld [vmem:[%s284_s25] sm:$0xf]  ;;  %vm376_vm1 = vcmask 60416   ;;  %s1332_s17 = smov 64   ;;  %s1043_s29 = smov 80  }
  0x2b   : > { %v830_v3 = vld [vmem:[%s1327_s2] ss:$0 sm:$0xff]  ;;  %s1199_s30 = scalar_lea.vmem [#allocation7], %s1195_s12  ;;  %s1044_s6 = smov 96  }
  0x2c   : > { %s1045_s7 = smov 120   ;;  %s1046_s13 = smov 72  }
  0x2d   : > { %s1047_s10 = smov 88   ;;  %s1048_s27 = smov 48  }
  0x2e   : > { %369 = vmatpush.bf16.msra.mxu0 %v728_v1  ;;  %s1049_s26 = smov 112   ;;  %s1050_s25 = smov 56  }
  0x2f   : > { %s1051_s28 = smov 40   ;;  %s1052_s11 = smov 104  }
  0x31   : > { %707 = vmatmul.msk.bf16.vlgmr.msra.gmra.mxu0 %vm358_vm0, %v337_v2 }
  0xae   : > { %v371_v4 = vpop.f32.mrf.mxu0 }
  0xaf   : > { %v372_v5 = vadd.f32 %v830_v3, %v371_v4 }
  0xb1   : > { %v375_v6 = vpack.c.bf16 %v372_v5, %v372_v5 }
  0xb3   : > { %383 = vrot.lane.b32.xlu2 %v375_v6, %s1332_s17  ;;  %407 = vrot.lane.b32.xlu1 %v375_v6, %s1043_s29  ;;  %377 = vst.msk [vmem:[%s1199_s30] sm:$0xf] %vm376_vm1, %v375_v6  ;;  %s1204_s29 = scalar_lea.vmem [#allocation10], %s1195_s12 }
  0xb4   : > { %379 = vrot.lane.b32.xlu0 %v375_v6, %s1044_s6  ;;  %s1213_s6 = sshll.u32 %s1029_s21, 4 }
  0xb6   : > { %v373_v7 = vpop.f32.mrf.mxu0 }
  0xbb   : > { %387 = vrot.lane.b32.xlu2 %v375_v6, %s1045_s7  ;;  %422 = vrot.lane.b32.xlu1 %v375_v6, %s1046_s13  ;;  %s322_s7 = scalar_lea.vmem [#allocation8], %s1195_s12 }
  0xbc   : > { %392 = vrot.lane.b32.xlu0 %v375_v6, %s1047_s10  ;;  %s911_s10 = scalar_lea.hbm %s1329_s4, 32 }
  0xc3   : > { %412 = vrot.lane.b32.xlu2 %v375_v6, %s1048_s27  ;;  %402 = vrot.lane.b32.xlu1 %v375_v6, %s1049_s26  ;;  %s477_s27 = scalar_lea.hbm %s1329_s4, %s1213_s6  ;;  %s478_s26 = sshll.u32 %s322_s7, 4  ;;  %s479_s26 = int_to_ptr.vmem [resolvable:$true] %s478_s26 }
  0xc4   : > { %397 = vrot.lane.b32.xlu0 %v375_v6, %s1050_s25  ;;  %s437_s25 = sand.u32 1, %s1115_s24  }
  0xc5   : > { %s1225_s21 = scalar_lea.sflag [#allocation9], %s437_s25 }
  0xcb   : > { %427 = vrot.lane.b32.xlu1 %v375_v6, %s1051_s28  ;;  %s480_s28 = sshll.u32 %s477_s27, 4  ;;  %s481_s28 = int_to_ptr.hbm [resolvable:$true] %s480_s28 }
  0xcc   : > { %417 = vrot.lane.b32.xlu0 %v375_v6, %s1052_s11  ;;  %s905_s12 = sshra.s32 %s481_s28, 4  ;;  %s906_s12 = int_to_ptr.hbm [resolvable:$true] %s905_s12 }
  0xcd   : > { %s907_s11 = scalar_lea.hbm %s906_s12, 16  ;;  %p912_p10 = scmp.lt.s32.totalorder %s906_s12, %s1329_s4 }
  0xce   : > { %p908_p1 = scmp.ne.s32.totalorder %s906_s12, %s907_s11  ;;  %p913_p11 = scmp.lt.s32.totalorder %s911_s10, %s907_s11 }
  0xd0   : > { %p909_p3 = pnand %p908_p1, %p1157_p4  ;;  %p914_p12 = por %p913_p11, %p912_p10 }
  0xd2   : > { %p910_p9 = pneg %p909_p3 }
  0xd4   : > { %p915_p13 = pnand %p914_p12, %p910_p9 }
 0x10d   : > { %v384_v8 = vpop.permute.xlu2 %383 }
 0x10e   : > { %386 = vst.msk [vmem:[%s1204_s29] sm:$0xf] %vm376_vm1, %v384_v8 }
 0x115   : > { %v388_v9 = vpop.permute.xlu2 %387 }
 0x116   : > { %708 = vst.msk [vmem:[%s1199_s30 + $0x4] sm:$0xf] %vm376_vm1, %v388_v9 }
 0x11d   : > { %v413_v10 = vpop.permute.xlu2 %412 }
 0x11e   : > { %713 = vst.msk [vmem:[%s1204_s29 + $0x8] sm:$0xf] %vm376_vm1, %v413_v10 }
 0x125   : > { %v408_v11 = vpop.permute.xlu1 %407 }
 0x126   : > { %712 = vst.msk [vmem:[%s322_s7 + $0x8] sm:$0xf] %vm376_vm1, %v408_v11  ;;  %v380_v12 = vpop.permute.xlu0 %379 }
 0x127   : > { %382 = vst.msk [vmem:[%s322_s7] sm:$0xf] %vm376_vm1, %v380_v12 }
 0x12d   : > { %v423_v13 = vpop.permute.xlu1 %422 }
 0x12e   : > { %715 = vst.msk [vmem:[%s322_s7 + $0xc] sm:$0xf] %vm376_vm1, %v423_v13  ;;  %v393_v14 = vpop.permute.xlu0 %392 }
 0x12f   : > { %709 = vst.msk [vmem:[%s322_s7 + $0x4] sm:$0xf] %vm376_vm1, %v393_v14 }
 0x130   : > { %918 = shalt.err (!%p915_p13)
}
 0x131   : > { %s1334_s7 = smov 4   ;;  %s1343_s25 = smov 64  }
 0x132   : > { %740 = dma.vmem_to_hbm [thread:$0]  (%p1157_p4), %s479_s26, 256, %s481_s28, %s1225_s21, %s1343_s25, %s1343_s25, %s1334_s7  }
 0x133   : > { %s457_s11 = scalar_lea.hbm %s1328_s3, %s1213_s6  ;;  %s497_s10 = scalar_lea.hbm %s1330_s5, %s1213_s6 }
 0x134   : > { %s458_s27 = sshll.u32 %s1199_s30, 4  ;;  %s1254_s0 = sshll.u32 %s457_s11, 4  ;;  %s459_s27 = int_to_ptr.vmem [resolvable:$true] %s458_s27  ;;  %s461_s0 = int_to_ptr.hbm [resolvable:$true] %s1254_s0 }
 0x135   : > { %v403_v15 = vpop.permute.xlu1 %402  ;;  %s498_s26 = sshll.u32 %s1204_s29, 4  ;;  %s1257_s28 = sshll.u32 %s497_s10, 4  ;;  %s1260_s26 = int_to_ptr.vmem [resolvable:$true] %s498_s26  ;;  %s501_s28 = int_to_ptr.hbm [resolvable:$true] %s1257_s28 }
 0x136   : > { %711 = vst.msk [vmem:[%s1199_s30 + $0x8] sm:$0xf] %vm376_vm1, %v403_v15  ;;  %v398_v16 = vpop.permute.xlu0 %397  ;;  %s433_s6 = scalar_lea.sflag [#allocation4], %s1179_s8  ;;  %s933_s17 = sshra.s32 %s461_s0, 4  ;;  %s934_s17 = int_to_ptr.hbm [resolvable:$true] %s933_s17 }
 0x137   : > { %710 = vst.msk [vmem:[%s1204_s29 + $0x4] sm:$0xf] %vm376_vm1, %v398_v16  ;;  %s935_s12 = scalar_lea.hbm %s934_s17, 16  ;;  %s939_s24 = scalar_lea.hbm %s1328_s3, 32 }
 0x138   : > { %p936_p0 = scmp.ne.s32.totalorder %s934_s17, %s935_s12  ;;  %p940_p8 = scmp.lt.s32.totalorder %s934_s17, %s1328_s3 }
 0x139   : > { %p941_p1 = scmp.lt.s32.totalorder %s939_s24, %s935_s12 }
 0x13a   : > { %p937_p2 = pnand %p936_p0, %p1157_p4 }
 0x13b   : > { %p942_p3 = por %p941_p1, %p940_p8 }
 0x13c   : > { %p938_p5 = pneg %p937_p2 }
 0x13d   : > { %v428_v17 = vpop.permute.xlu1 %427 }
 0x13e   : > { %716 = vst.msk [vmem:[%s1204_s29 + $0xc] sm:$0xf] %vm376_vm1, %v428_v17  ;;  %v418_v18 = vpop.permute.xlu0 %417  ;;  %p943_p9 = pnand %p942_p3, %p938_p5 }
 0x13f   : > { %714 = vst.msk [vmem:[%s1199_s30 + $0xc] sm:$0xf] %vm376_vm1, %v418_v18 }
 0x140   : > { %946 = shalt.err (!%p943_p9)
}
 0x141   : > { %s1344_s8 = smov 4   ;;  %s961_s30 = sshra.s32 %s501_s28, 4  ;;  %s962_s30 = int_to_ptr.hbm [resolvable:$true] %s961_s30 }
 0x142   : > { %739 = dma.vmem_to_hbm [thread:$0]  (%p1157_p4), %s459_s27, 256, %s461_s0, %s433_s6, %s1343_s25, %s1343_s25, %s1344_s8  }
 0x143   : > { %s963_s29 = scalar_lea.hbm %s962_s30, 16  ;;  %s967_s12 = scalar_lea.hbm %s1330_s5, 32 }
 0x144   : > { %p964_p10 = scmp.ne.s32.totalorder %s962_s30, %s963_s29  ;;  %p968_p13 = scmp.lt.s32.totalorder %s962_s30, %s1330_s5 }
 0x145   : > { %p969_p0 = scmp.lt.s32.totalorder %s967_s12, %s963_s29 }
 0x146   : > { %p965_p11 = pnand %p964_p10, %p1157_p4 }
 0x147   : > { %p970_p2 = por %p969_p0, %p968_p13 }
 0x148   : > { %p966_p12 = pneg %p965_p11 }
 0x14a   : > { %p971_p5 = pnand %p970_p2, %p966_p12 }
 0x14c   : > { %974 = shalt.err (!%p971_p5)
}
 0x14d   : > { %741 = dma.vmem_to_hbm [thread:$0]  (%p1157_p4), %s1260_s26, 256, %s501_s28, %s1225_s21, %s1343_s25, %s1343_s25, %s1344_s8  }
 0x14e PF: > { %s515_s0 = sand.u32 1, %s1017_s18   ;;  %p754_p8 = pnand %p690_p6, %p1165_p7 }
 0x14f   : > { %s516_s27 = scalar_lea.sflag [#allocation4], %s515_s0 }
 0x150   : > { %p755_p1 = pneg %p754_p8 }
 0x152   : > { %1008 = dma.done.wait (%p755_p1), %s516_s27, 256  }
 0x153   : > { %1010 = vsyncadd (%p755_p1), %s516_s27, 4294967040  ;;  %s1345_s14 = sadd.s32 4294967294, %s1037_s23  }
 0x154   : > { %s525_s6 = sand.u32 1, %s1345_s14  }
 0x155   : > { %s526_s24 = scalar_lea.sflag [#allocation9], %s525_s6 }
 0x156   : > { %1012 = dma.done.wait (%p755_p1), %s526_s24, 512  }
 0x157   : > { %1014 = vsyncadd (%p755_p1), %s526_s24, 4294966784  ;;  %s26_s23 = sadd.s32 1, %s1037_s23   ;;  %s1346_s18 = smov %s1021_s19 }
 0x158   : > { %p23_p4 = scmp.ge.s32.totalorder %s26_s23, 4   ;;  %s1347_s19 = smov %s1025_s20 }
 0x159   : > { %s1348_s20 = smov %s1163_s15  ;;  %s1349_s21 = smov %s1033_s22 }
 0x15a   : > { %s1350_s22 = smov %s1352_s9  ;;  %25 = sbr.rel (!%p23_p4) target bundleno = 11 (0xb), region = 126 }
 0x15f   :  { %542 = vsyncpa [#allocation3], 1 }
 0x160   :  { %544 = vsyncpa [#allocation3 + $0x1], 1 }
 0x161   :  { %545 = vsyncpa [#allocation6], 1 }
 0x162   :  { %546 = vsyncpa [#allocation4], 1 }
 0x163   :  { %548 = vsyncpa [#allocation4 + $0x1], 1 }
 0x164   :  { %549 = vsyncpa [#allocation9], 1 }
 0x165   :  { %551 = vsyncpa [#allocation9 + $0x1], 1 }

</bundles_post_ra>
